<compile_context>
chip_gen: v5e
topology: v5e:2x2
jax: 0.10.0
libtpu: 0.0.40
codegen_flags: <defaults>
</compile_context>

<pallas_src>
import jax
import jax.numpy as jnp
from jax import lax
from jax.experimental import pallas as pl
from jax.experimental.pallas import tpu as pltpu

SIZES = [100, 80, 60, 50, 30, 1]     # real layer widths of the PyTorch module
PAD   = [112, 80, 64, 64, 32, 16]    # sublane-padded widths (multiples of 16)


def mlp_kernel(x_ref, w1_ref, w2_ref, w3_ref, w4_ref, w5_ref, w6_ref, b_ref, o_ref):
    # x_ref : (tb, in_size) f32   natural input layout (no wrapper transpose/pad)
    # w1_ref: (PAD[0], in_size)   bf16  W1^T, zero-padded rows
    # wK_ref: (PAD[k], PAD[k-1])  bf16  W_k^T, zero-padded
    # b_ref : (6, 128, 1) f32     stacked biases, zero-padded
    # o_ref : (1, tb) f32         sigmoid(out), batch on lanes (lane-dense)
    x = x_ref[...].astype(jnp.bfloat16)                            # (tb, in)

    # Layer 1: contract over the shared last dim -> (PAD[0], tb).  This is the
    # q @ k^T form; Mosaic handles the transposed RHS (XLU work overlaps MXU).
    z = lax.dot_general(w1_ref[...], x, (((1,), (1,)), ((), ())),
                        preferred_element_type=jnp.float32)
    z = z + b_ref[0, :z.shape[0], :]
    h = jnp.maximum(z, 0.0).astype(jnp.bfloat16)

    for l, w_ref in enumerate((w2_ref, w3_ref, w4_ref, w5_ref, w6_ref), start=1):
        z = jnp.dot(w_ref[...], h, preferred_element_type=jnp.float32)
        z = z + b_ref[l, :z.shape[0], :]
        if l < 5:
            # NOTE: on v6e/v7x this epilogue could run in bf16 (2 elem per lane
            # slot); kept in f32 for v5e portability.
            h = jnp.maximum(z, 0.0).astype(jnp.bfloat16)

    # Only row 0 of the (padded) last layer is the real output column.
    o_ref[...] = jax.nn.sigmoid(z[0:1, :])


def _round_up(x, m):
    return (x + m - 1) // m * m


def _choose_tb(batch, target_tb=2048):
    """Pick a 128-aligned batch tile that minimizes padding and, when the batch
    is large enough, gives >=2 grid steps so v7x's two TensorCores both work."""
    b_ceil = _round_up(batch, 128)
    steps = pl.cdiv(b_ceil, target_tb)
    if b_ceil >= 2 * 128:
        steps = max(steps, 2)
    return _round_up(pl.cdiv(b_ceil, steps), 128)


def init_params(key, input_size):
    """Deterministic init mimicking nn.Linear's default U(-1/sqrt(fan_in), 1/sqrt(fan_in))."""
    sizes = [input_size] + SIZES
    params = []
    for i in range(6):
        fan_in, fan_out = sizes[i], sizes[i + 1]
        key, kw, kb = jax.random.split(key, 3)
        bound = 1.0 / jnp.sqrt(jnp.float32(fan_in))
        w = jax.random.uniform(kw, (fan_in, fan_out), jnp.float32, -bound, bound)
        b = jax.random.uniform(kb, (1, fan_out), jnp.float32, -bound, bound)
        params.append((w, b))
    return params


def pack_params(params, input_size):
    """Transpose and zero-pad weights to per-layer 16-multiples; stack biases."""
    in_dims = [input_size] + PAD[:-1]
    wts = []
    for l, (w, _) in enumerate(params):
        wt = jnp.zeros((PAD[l], in_dims[l]), jnp.float32)
        wt = wt.at[:w.shape[1], :w.shape[0]].set(w.T)
        wts.append(wt.astype(jnp.bfloat16))

    b_stack = jnp.zeros((6, 128, 1), jnp.float32)
    for l, (_, b) in enumerate(params):
        b_stack = b_stack.at[l, :b.shape[1], 0].set(b[0])
    return wts, b_stack


def network_forward(x, params, *, target_tb=2048):
    """x: (B, input_size) float32 -> (B, 1) float32, matching the PyTorch module."""
    B, in_size = x.shape
    wts, b_stack = pack_params(params, in_size)

    tb = _choose_tb(B, target_tb)
    steps = pl.cdiv(B, tb)

    flops = 2 * B * (in_size * PAD[0] + sum(PAD[i] * PAD[i + 1] for i in range(5)))
    bytes_acc = B * in_size * 4 + steps * tb * 4 \
        + sum(int(w.size) * 2 for w in wts) + 6 * 128 * 4
    cost = pl.CostEstimate(flops=int(flops), transcendentals=int(B),
                           bytes_accessed=int(bytes_acc))

    w_specs = [pl.BlockSpec(tuple(w.shape), lambda i: (0, 0)) for w in wts]

    out = pl.pallas_call(
        mlp_kernel,
        out_shape=jax.ShapeDtypeStruct((1, steps * tb), jnp.float32),
        grid_spec=pltpu.PrefetchScalarGridSpec(
            num_scalar_prefetch=0,
            grid=(steps,),
            in_specs=[pl.BlockSpec((tb, in_size), lambda i: (i, 0))]  # x tile
                     + w_specs                                        # resident weights
                     + [pl.BlockSpec((6, 128, 1), lambda i: (0, 0, 0))],  # biases
            out_specs=pl.BlockSpec((1, tb), lambda i: (0, i)),        # lane-dense
        ),
        compiler_params=pltpu.CompilerParams(
            dimension_semantics=("parallel",)),
        cost_estimate=cost,
    )(x, *wts, b_stack)

    # (1, steps*tb) -> (B, 1): tiny slice/reshape, free XLA plumbing.
    return out[0, :B].reshape(B, 1)


def reference_forward(x, params, dtype=jnp.float32):
    """Pure-JAX reference; dtype controls the matmul operand precision."""
    h = x.astype(dtype)
    for (w, b) in params[:-1]:
        z = jnp.dot(h, w.astype(dtype), preferred_element_type=jnp.float32) + b
        h = jnp.maximum(z, 0.0).astype(dtype)
    w, b = params[-1]
    z = jnp.dot(h, w.astype(dtype), preferred_element_type=jnp.float32) + b
    return jax.nn.sigmoid(z)


if __name__ == "__main__":
    key = jax.random.PRNGKey(0)
    k_x, k_p = jax.random.split(key)

    input_size = 32
    params = init_params(k_p, input_size)

    # Primary small-shape check.
    batch = 16
    x = jax.random.normal(k_x, (batch, input_size), jnp.float32)
    out = jax.block_until_ready(network_forward(x, params))
    assert out.shape == (batch, 1), out.shape

    ref_bf16 = reference_forward(x, params, jnp.bfloat16)
    err = float(jnp.max(jnp.abs(out - ref_bf16)))
    assert err < 2e-3, err

    ref_f32 = reference_forward(x, params, jnp.float32)
    err32 = float(jnp.max(jnp.abs(out - ref_f32)))
    assert err32 < 2e-2, err32

    # Ragged batch (not a multiple of the 128-aligned tile) + 2-step grid.
    batch2 = 200
    x2 = jax.random.normal(jax.random.fold_in(key, 123),
                           (batch2, input_size), jnp.float32)
    out2 = jax.block_until_ready(network_forward(x2, params))
    assert out2.shape == (batch2, 1), out2.shape
    err2 = float(jnp.max(jnp.abs(out2 - reference_forward(x2, params, jnp.bfloat16))))
    assert err2 < 2e-3, err2

    print("KERNEL_OK")
</pallas_src>

<mosaic_0001>
module attributes {stable_mosaic.version = 11 : i64} {
  func.func @mlp_kernel(%arg0: i32, %arg1: memref<128x32xf32, #tpu.memory_space<vmem>>, %arg2: memref<112x32xbf16, #tpu.memory_space<vmem>>, %arg3: memref<80x112xbf16, #tpu.memory_space<vmem>>, %arg4: memref<64x80xbf16, #tpu.memory_space<vmem>>, %arg5: memref<64x64xbf16, #tpu.memory_space<vmem>>, %arg6: memref<32x64xbf16, #tpu.memory_space<vmem>>, %arg7: memref<16x32xbf16, #tpu.memory_space<vmem>>, %arg8: memref<6x128x1xf32, #tpu.memory_space<vmem>>, %arg9: memref<1x128xf32, #tpu.memory_space<vmem>>) attributes {dimension_semantics = [#tpu.dimension_semantics<parallel>], iteration_bounds = array<i64: 1>, scalar_prefetch = 0 : i64, scratch_operands = 0 : i64, tpu.core_type = #tpu.core_type<tc>, window_params = [{transform_indices = @transform_0, window_bounds = array<i64: 128, 32>}, {pipeline_mode = #tpu.pipeline_mode<synchronous>, transform_indices = @transform_1, window_bounds = array<i64: 112, 32>}, {pipeline_mode = #tpu.pipeline_mode<synchronous>, transform_indices = @transform_2, window_bounds = array<i64: 80, 112>}, {pipeline_mode = #tpu.pipeline_mode<synchronous>, transform_indices = @transform_3, window_bounds = array<i64: 64, 80>}, {pipeline_mode = #tpu.pipeline_mode<synchronous>, transform_indices = @transform_4, window_bounds = array<i64: 64, 64>}, {pipeline_mode = #tpu.pipeline_mode<synchronous>, transform_indices = @transform_5, window_bounds = array<i64: 32, 64>}, {pipeline_mode = #tpu.pipeline_mode<synchronous>, transform_indices = @transform_6, window_bounds = array<i64: 16, 32>}, {pipeline_mode = #tpu.pipeline_mode<synchronous>, transform_indices = @transform_7, window_bounds = array<i64: 6, 128, 1>}, {transform_indices = @transform_8, window_bounds = array<i64: 1, 128>}]} {
    %c0 = arith.constant 0 : index
    %c0_0 = arith.constant 0 : index
    %0 = vector.load %arg1[%c0, %c0_0] : memref<128x32xf32, #tpu.memory_space<vmem>>, vector<128x32xf32>
    %1 = arith.truncf %0 : vector<128x32xf32> to vector<128x32xbf16>
    %c0_1 = arith.constant 0 : index
    %c0_2 = arith.constant 0 : index
    %2 = vector.load %arg2[%c0_1, %c0_2] : memref<112x32xbf16, #tpu.memory_space<vmem>>, vector<112x32xbf16>
    %cst = arith.constant dense<0.000000e+00> : vector<112x128xf32>
    %3 = tpu.matmul %2, %1, %cst {dimension_numbers = #tpu.dot_dimension_numbers<[1], [1], [0], [0], [0, 0, 1, 0], [], []>} : vector<112x32xbf16>, vector<128x32xbf16>, vector<112x128xf32> -> vector<112x128xf32>
    %c0_3 = arith.constant 0 : index
    %c0_4 = arith.constant 0 : index
    %c0_5 = arith.constant 0 : index
    %4 = vector.load %arg8[%c0_3, %c0_4, %c0_5] : memref<6x128x1xf32, #tpu.memory_space<vmem>>, vector<1x112x1xf32>
    %5 = vector.shape_cast %4 : vector<1x112x1xf32> to vector<112x1xf32>
    %6 = vector.broadcast %5 : vector<112x1xf32> to vector<112x128xf32>
    %7 = arith.addf %3, %6 : vector<112x128xf32>
    %cst_6 = arith.constant 0.000000e+00 : f32
    %8 = vector.broadcast %cst_6 : f32 to vector<112x128xf32>
    %9 = arith.maximumf %7, %8 : vector<112x128xf32>
    %10 = arith.truncf %9 : vector<112x128xf32> to vector<112x128xbf16>
    %c0_7 = arith.constant 0 : index
    %c0_8 = arith.constant 0 : index
    %11 = vector.load %arg3[%c0_7, %c0_8] : memref<80x112xbf16, #tpu.memory_space<vmem>>, vector<80x112xbf16>
    %cst_9 = arith.constant dense<0.000000e+00> : vector<80x128xf32>
    %12 = tpu.matmul %11, %10, %cst_9 {dimension_numbers = #tpu.dot_dimension_numbers<[1], [0], [0], [1], [0, 0, 1, 1], [], []>} : vector<80x112xbf16>, vector<112x128xbf16>, vector<80x128xf32> -> vector<80x128xf32>
    %c1 = arith.constant 1 : index
    %c0_10 = arith.constant 0 : index
    %c0_11 = arith.constant 0 : index
    %13 = vector.load %arg8[%c1, %c0_10, %c0_11] : memref<6x128x1xf32, #tpu.memory_space<vmem>>, vector<1x80x1xf32>
    %14 = vector.shape_cast %13 : vector<1x80x1xf32> to vector<80x1xf32>
    %15 = vector.broadcast %14 : vector<80x1xf32> to vector<80x128xf32>
    %16 = arith.addf %12, %15 : vector<80x128xf32>
    %cst_12 = arith.constant 0.000000e+00 : f32
    %17 = vector.broadcast %cst_12 : f32 to vector<80x128xf32>
    %18 = arith.maximumf %16, %17 : vector<80x128xf32>
    %19 = arith.truncf %18 : vector<80x128xf32> to vector<80x128xbf16>
    %c0_13 = arith.constant 0 : index
    %c0_14 = arith.constant 0 : index
    %20 = vector.load %arg4[%c0_13, %c0_14] : memref<64x80xbf16, #tpu.memory_space<vmem>>, vector<64x80xbf16>
    %cst_15 = arith.constant dense<0.000000e+00> : vector<64x128xf32>
    %21 = tpu.matmul %20, %19, %cst_15 {dimension_numbers = #tpu.dot_dimension_numbers<[1], [0], [0], [1], [0, 0, 1, 1], [], []>} : vector<64x80xbf16>, vector<80x128xbf16>, vector<64x128xf32> -> vector<64x128xf32>
    %c2 = arith.constant 2 : index
    %c0_16 = arith.constant 0 : index
    %c0_17 = arith.constant 0 : index
    %22 = vector.load %arg8[%c2, %c0_16, %c0_17] : memref<6x128x1xf32, #tpu.memory_space<vmem>>, vector<1x64x1xf32>
    %23 = vector.shape_cast %22 : vector<1x64x1xf32> to vector<64x1xf32>
    %24 = vector.broadcast %23 : vector<64x1xf32> to vector<64x128xf32>
    %25 = arith.addf %21, %24 : vector<64x128xf32>
    %cst_18 = arith.constant 0.000000e+00 : f32
    %26 = vector.broadcast %cst_18 : f32 to vector<64x128xf32>
    %27 = arith.maximumf %25, %26 : vector<64x128xf32>
    %28 = arith.truncf %27 : vector<64x128xf32> to vector<64x128xbf16>
    %c0_19 = arith.constant 0 : index
    %c0_20 = arith.constant 0 : index
    %29 = vector.load %arg5[%c0_19, %c0_20] : memref<64x64xbf16, #tpu.memory_space<vmem>>, vector<64x64xbf16>
    %cst_21 = arith.constant dense<0.000000e+00> : vector<64x128xf32>
    %30 = tpu.matmul %29, %28, %cst_21 {dimension_numbers = #tpu.dot_dimension_numbers<[1], [0], [0], [1], [0, 0, 1, 1], [], []>} : vector<64x64xbf16>, vector<64x128xbf16>, vector<64x128xf32> -> vector<64x128xf32>
    %c3 = arith.constant 3 : index
    %c0_22 = arith.constant 0 : index
    %c0_23 = arith.constant 0 : index
    %31 = vector.load %arg8[%c3, %c0_22, %c0_23] : memref<6x128x1xf32, #tpu.memory_space<vmem>>, vector<1x64x1xf32>
    %32 = vector.shape_cast %31 : vector<1x64x1xf32> to vector<64x1xf32>
    %33 = vector.broadcast %32 : vector<64x1xf32> to vector<64x128xf32>
    %34 = arith.addf %30, %33 : vector<64x128xf32>
    %cst_24 = arith.constant 0.000000e+00 : f32
    %35 = vector.broadcast %cst_24 : f32 to vector<64x128xf32>
    %36 = arith.maximumf %34, %35 : vector<64x128xf32>
    %37 = arith.truncf %36 : vector<64x128xf32> to vector<64x128xbf16>
    %c0_25 = arith.constant 0 : index
    %c0_26 = arith.constant 0 : index
    %38 = vector.load %arg6[%c0_25, %c0_26] : memref<32x64xbf16, #tpu.memory_space<vmem>>, vector<32x64xbf16>
    %cst_27 = arith.constant dense<0.000000e+00> : vector<32x128xf32>
    %39 = tpu.matmul %38, %37, %cst_27 {dimension_numbers = #tpu.dot_dimension_numbers<[1], [0], [0], [1], [0, 0, 1, 1], [], []>} : vector<32x64xbf16>, vector<64x128xbf16>, vector<32x128xf32> -> vector<32x128xf32>
    %c4 = arith.constant 4 : index
    %c0_28 = arith.constant 0 : index
    %c0_29 = arith.constant 0 : index
    %40 = vector.load %arg8[%c4, %c0_28, %c0_29] : memref<6x128x1xf32, #tpu.memory_space<vmem>>, vector<1x32x1xf32>
    %41 = vector.shape_cast %40 : vector<1x32x1xf32> to vector<32x1xf32>
    %42 = vector.broadcast %41 : vector<32x1xf32> to vector<32x128xf32>
    %43 = arith.addf %39, %42 : vector<32x128xf32>
    %cst_30 = arith.constant 0.000000e+00 : f32
    %44 = vector.broadcast %cst_30 : f32 to vector<32x128xf32>
    %45 = arith.maximumf %43, %44 : vector<32x128xf32>
    %46 = arith.truncf %45 : vector<32x128xf32> to vector<32x128xbf16>
    %c0_31 = arith.constant 0 : index
    %c0_32 = arith.constant 0 : index
    %47 = vector.load %arg7[%c0_31, %c0_32] : memref<16x32xbf16, #tpu.memory_space<vmem>>, vector<16x32xbf16>
    %cst_33 = arith.constant dense<0.000000e+00> : vector<16x128xf32>
    %48 = tpu.matmul %47, %46, %cst_33 {dimension_numbers = #tpu.dot_dimension_numbers<[1], [0], [0], [1], [0, 0, 1, 1], [], []>} : vector<16x32xbf16>, vector<32x128xbf16>, vector<16x128xf32> -> vector<16x128xf32>
    %c5 = arith.constant 5 : index
    %c0_34 = arith.constant 0 : index
    %c0_35 = arith.constant 0 : index
    %49 = vector.load %arg8[%c5, %c0_34, %c0_35] : memref<6x128x1xf32, #tpu.memory_space<vmem>>, vector<1x16x1xf32>
    %50 = vector.shape_cast %49 : vector<1x16x1xf32> to vector<16x1xf32>
    %51 = vector.broadcast %50 : vector<16x1xf32> to vector<16x128xf32>
    %52 = arith.addf %48, %51 : vector<16x128xf32>
    %53 = vector.extract_strided_slice %52 {offsets = [0, 0], sizes = [1, 128], strides = [1, 1]} : vector<16x128xf32> to vector<1x128xf32>
    %54 = arith.negf %53 : vector<1x128xf32>
    %55 = math.exp %54 : vector<1x128xf32>
    %cst_36 = arith.constant 1.000000e+00 : f32
    %56 = vector.broadcast %cst_36 : f32 to vector<1x128xf32>
    %57 = arith.addf %56, %55 : vector<1x128xf32>
    %58 = arith.divf %56, %57 : vector<1x128xf32>
    %c0_37 = arith.constant 0 : index
    %c0_38 = arith.constant 0 : index
    %59 = vector.load %arg9[%c0_37, %c0_38] : memref<1x128xf32, #tpu.memory_space<vmem>>, vector<1x128xf32>
    tpu.vector_store %arg9[%c0_37, %c0_38], %58 {strides = array<i32>} : memref<1x128xf32, #tpu.memory_space<vmem>>, vector<1x128xf32>,
    return
  }
  func.func @transform_0(%arg0: i32) -> (i32, i32) {
    %c0_i32 = arith.constant 0 : i32
    %c0_i32_0 = arith.constant 0 : i32
    return %arg0, %c0_i32 : i32, i32
  }
  func.func @transform_1(%arg0: i32) -> (i32, i32) {
    %c0_i32 = arith.constant 0 : i32
    %c0_i32_0 = arith.constant 0 : i32
    %c0_i32_1 = arith.constant 0 : i32
    return %c0_i32, %c0_i32_0 : i32, i32
  }
  func.func @transform_2(%arg0: i32) -> (i32, i32) {
    %c0_i32 = arith.constant 0 : i32
    %c0_i32_0 = arith.constant 0 : i32
    %c0_i32_1 = arith.constant 0 : i32
    return %c0_i32, %c0_i32_0 : i32, i32
  }
  func.func @transform_3(%arg0: i32) -> (i32, i32) {
    %c0_i32 = arith.constant 0 : i32
    %c0_i32_0 = arith.constant 0 : i32
    %c0_i32_1 = arith.constant 0 : i32
    return %c0_i32, %c0_i32_0 : i32, i32
  }
  func.func @transform_4(%arg0: i32) -> (i32, i32) {
    %c0_i32 = arith.constant 0 : i32
    %c0_i32_0 = arith.constant 0 : i32
    %c0_i32_1 = arith.constant 0 : i32
    return %c0_i32, %c0_i32_0 : i32, i32
  }
  func.func @transform_5(%arg0: i32) -> (i32, i32) {
    %c0_i32 = arith.constant 0 : i32
    %c0_i32_0 = arith.constant 0 : i32
    %c0_i32_1 = arith.constant 0 : i32
    return %c0_i32, %c0_i32_0 : i32, i32
  }
  func.func @transform_6(%arg0: i32) -> (i32, i32) {
    %c0_i32 = arith.constant 0 : i32
    %c0_i32_0 = arith.constant 0 : i32
    %c0_i32_1 = arith.constant 0 : i32
    return %c0_i32, %c0_i32_0 : i32, i32
  }
  func.func @transform_7(%arg0: i32) -> (i32, i32, i32) {
    %c0_i32 = arith.constant 0 : i32
    %c0_i32_0 = arith.constant 0 : i32
    %c0_i32_1 = arith.constant 0 : i32
    %c0_i32_2 = arith.constant 0 : i32
    return %c0_i32, %c0_i32_0, %c0_i32_1 : i32, i32, i32
  }
  func.func @transform_8(%arg0: i32) -> (i32, i32) {
    %c0_i32 = arith.constant 0 : i32
    %c0_i32_0 = arith.constant 0 : i32
    return %c0_i32, %arg0 : i32, i32
  }
}

</mosaic_0001>

<bundles_post_ra>
// kernel: tpu_custom_call.1
= control target key start
LH: loop header
LB: loop body
LE: loop exit
PB: predicated region body
PF: predicated region fallthrough
CT: control target
= control target key end

     0   :  { %vm188_vm0 = vcmask 261120   ;;  %s1393_s0 = inlined_call_operand.vmem [shape: f32[16,32], index: 0, kind: input, shape index: {}]   ;;  %s1394_s1 = inlined_call_operand.vmem [shape: bf16[112,32], index: 1, kind: input, shape index: {}]   ;;  %s1395_s2 = inlined_call_operand.vmem [shape: bf16[80,112], index: 2, kind: input, shape index: {}]   ;;  %s1396_s3 = inlined_call_operand.vmem [shape: bf16[64,80], index: 3, kind: input, shape index: {}]   ;;  %s1397_s4 = inlined_call_operand.vmem [shape: bf16[64,64], index: 4, kind: input, shape index: {}]   ;;  %s1398_s5 = inlined_call_operand.vmem [shape: bf16[32,64], index: 5, kind: input, shape index: {}]   ;;  %s1399_s6 = inlined_call_operand.vmem [shape: bf16[16,32], index: 6, kind: input, shape index: {}]   ;;  %s1400_s7 = inlined_call_operand.vmem [shape: f32[6,128,1], index: 7, kind: input, shape index: {}]   ;;  %s1401_s8 = inlined_call_operand.hbm [shape: f32[1,128], index: 8, kind: output, shape index: {}]  }
   0x1   :  { %v45_v0 = vld [vmem:[%s1393_s0 + $0x70] sm:$0xff]  ;;  %v46_v1 = vld [vmem:[%s1393_s0 + $0x78] sm:$0xff]  ;;  %v43_v3 = vld [vmem:[%s1393_s0 + $0x60] sm:$0xff] }
   0x2   :  { %v54_v2 = vpack.c.bf16 %v46_v1, %v45_v0  ;;  %v44_v4 = vld [vmem:[%s1393_s0 + $0x68] sm:$0xff] }
   0x4   :  { %v232_v5 = vsel %vm188_vm0, %v54_v2, 0 }
   0x5   :  { %13 = vsyncpa [#allocation3], 0  ;;  %234 = vmatpush.bf16.xpose.msra.mxu0 %v232_v5  ;;  %v53_v6 = vpack.c.bf16 %v44_v4, %v43_v3  ;;  %v41_v8 = vld [vmem:[%s1393_s0 + $0x50] sm:$0xff]  ;;  %v42_v9 = vld [vmem:[%s1393_s0 + $0x58] sm:$0xff]  ;;  %v1069_v12 = vmov 0   ;;  %vm395_vm1 = vcmask 916480  }
   0x6   :  { %v81_v10 = vld [vmem:[%s1400_s7 + $0x60] sm:$0xff]  ;;  %v52_v11 = vpack.c.bf16 %v42_v9, %v41_v8  ;;  %1036 = vset.pattern.permute.xlu0 %v1069_v12  ;;  %1037 = vset.pattern.permute.xlu1 %v1069_v12  ;;  %v40_v15 = vld [vmem:[%s1393_s0 + $0x48] sm:$0xff]  ;;  %v79_v17 = vld [vmem:[%s1400_s7 + $0x50] sm:$0xff]  ;;  %vm537_vm2 = vcmask 654336   ;;  %vm668_vm3 = vcmask 523264   ;;  %s854_s9 = sshll.u32 %s1401_s8, 4  ;;  %s855_s9 = int_to_ptr.hbm [resolvable:$true] %s854_s9 }
   0x7   :  { %v229_v7 = vsel %vm188_vm0, %v53_v6, 0  ;;  %145 = vperm.xlu0 %1036, %v81_v10   ;;  %1038 = vset.pattern.permute.xlu2 %v1069_v12  ;;  %v39_v14 = vld [vmem:[%s1393_s0 + $0x40] sm:$0xff]  ;;  %v82_v16 = vld [vmem:[%s1400_s7 + $0x68] sm:$0xff]  ;;  %v37_v20 = vld [vmem:[%s1393_s0 + $0x30] sm:$0xff] }
   0x8   :  { %v226_v13 = vsel %vm188_vm0, %v52_v11, 0  ;;  %v51_v18 = vpack.c.bf16 %v40_v15, %v39_v14  ;;  %135 = vperm.xlu1 %1037, %v79_v17   ;;  %v38_v21 = vld [vmem:[%s1393_s0 + $0x38] sm:$0xff]  ;;  %v75_v23 = vld [vmem:[%s1400_s7 + $0x30] sm:$0xff]  ;;  %v35_v26 = vld [vmem:[%s1393_s0 + $0x20] sm:$0xff] }
   0x9   :  { %v80_v22 = vld [vmem:[%s1400_s7 + $0x58] sm:$0xff]  ;;  %v50_v24 = vpack.c.bf16 %v38_v21, %v37_v20  ;;  %v36_v27 = vld [vmem:[%s1393_s0 + $0x28] sm:$0xff]  ;;  %v33_v32 = vld [vmem:[%s1393_s0 + $0x10] sm:$0xff] }
   0xa   :  { %v223_v19 = vsel %vm188_vm0, %v51_v18, 0  ;;  %v76_v28 = vld [vmem:[%s1400_s7 + $0x38] sm:$0xff]  ;;  %v74_v29 = vld [vmem:[%s1400_s7 + $0x28] sm:$0xff]  ;;  %v49_v30 = vpack.c.bf16 %v36_v27, %v35_v26  ;;  %v71_v34 = vld [vmem:[%s1400_s7 + $0x10] sm:$0xff] }
   0xb   :  { %v220_v25 = vsel %vm188_vm0, %v50_v24, 0  ;;  %v34_v33 = vld [vmem:[%s1393_s0 + $0x18] sm:$0xff]  ;;  %v69_v35 = vld [vmem:[%s1400_s7] sm:$0xff]  ;;  %v32_v39 = vld [vmem:[%s1393_s0 + $0x8] sm:$0xff] }
   0xc   :  { %v217_v31 = vsel %vm188_vm0, %v49_v30, 0  ;;  %v48_v36 = vpack.c.bf16 %v34_v33, %v33_v32  ;;  %v31_v38 = vld [vmem:[%s1393_s0] sm:$0xff]  ;;  %v70_v40 = vld [vmem:[%s1400_s7 + $0x8] sm:$0xff]  ;;  %v904_v46 = vld [vmem:[%s1400_s7 + $0xb0] sm:$0xff] }
   0xd   :  { %235 = vmatpush.bf16.xpose.msra.mxu0 %v229_v7  ;;  %v77_v41 = vld [vmem:[%s1400_s7 + $0x40] sm:$0xff]  ;;  %v47_v42 = vpack.c.bf16 %v32_v39, %v31_v38  ;;  %v78_v44 = vld [vmem:[%s1400_s7 + $0x48] sm:$0xff]  ;;  %v72_v51 = vld [vmem:[%s1400_s7 + $0x18] sm:$0xff] }
   0xe   :  { %v214_v37 = vsel %vm188_vm0, %v48_v36, 0  ;;  %125 = vperm.xlu2 %1038, %v77_v41   ;;  %v1011_v45 = vld [vmem:[%s1394_s1] sm:$0xff]  ;;  %v907_v47 = vld [vmem:[%s1400_s7 + $0xc8] sm:$0xff]  ;;  %v901_v54 = vld [vmem:[%s1400_s7 + $0x98] sm:$0xff] }
   0xf   :  { %150 = vperm.xlu0 %1036, %v82_v16   ;;  %v211_v43 = vsel %vm188_vm0, %v47_v42, 0  ;;  %v73_v48 = vld [vmem:[%s1400_s7 + $0x20] sm:$0xff]  ;;  %v903_v49 = vld [vmem:[%s1400_s7 + $0xa8] sm:$0xff]  ;;  %v940_v56 = vld [vmem:[%s1400_s7 + $0x138] sm:$0xff] }
  0x10   :  { %140 = vperm.xlu1 %1037, %v80_v22   ;;  %v902_v50 = vld [vmem:[%s1400_s7 + $0xa0] sm:$0xff]  ;;  %v1012_v52 = vld [vmem:[%s1394_s1 + $0x8] sm:$0xff]  ;;  %v939_v57 = vld [vmem:[%s1400_s7 + $0x130] sm:$0xff] }
  0x11   :  { %v898_v53 = vld [vmem:[%s1400_s7 + $0x80] sm:$0xff]  ;;  %v905_v58 = vld [vmem:[%s1400_s7 + $0xb8] sm:$0xff]  ;;  %v1013_v59 = vld [vmem:[%s1394_s1 + $0x10] sm:$0xff] }
  0x12   :  { %v906_v55 = vld [vmem:[%s1400_s7 + $0xc0] sm:$0xff]  ;;  %v935_v60 = vld [vmem:[%s1400_s7 + $0x110] sm:$0xff]  ;;  %v938_v61 = vld [vmem:[%s1400_s7 + $0x128] sm:$0xff] }
  0x13   :  { %v900_v62 = vld [vmem:[%s1400_s7 + $0x90] sm:$0xff]  ;;  %v934_v63 = vld [vmem:[%s1400_s7 + $0x108] sm:$0xff]  ;;  %v933_v0 = vld [vmem:[%s1400_s7 + $0x100] sm:$0xff] }
  0x14   :  { %v899_v1 = vld [vmem:[%s1400_s7 + $0x88] sm:$0xff]  ;;  %v1014_v2 = vld [vmem:[%s1394_s1 + $0x18] sm:$0xff]  ;;  %v965_v3 = vld [vmem:[%s1400_s7 + $0x1a0] sm:$0xff] }
  0x15   :  { %236 = vmatpush.bf16.xpose.msra.mxu0 %v226_v13  ;;  %v968_v4 = vld [vmem:[%s1400_s7 + $0x1b8] sm:$0xff]  ;;  %v937_v5 = vld [vmem:[%s1400_s7 + $0x120] sm:$0xff]  ;;  %v963_v7 = vld [vmem:[%s1400_s7 + $0x190] sm:$0xff] }
  0x16   :  { %130 = vperm.xlu2 %1038, %v78_v44   ;;  %v964_v6 = vld [vmem:[%s1400_s7 + $0x198] sm:$0xff]  ;;  %v1015_v9 = vld [vmem:[%s1394_s1 + $0x20] sm:$0xff]  ;;  %v991_v10 = vld [vmem:[%s1400_s7 + $0x210] sm:$0xff] }
  0x17   :  { %115 = vperm.xlu0 %1036, %v75_v23   ;;  %v936_v8 = vld [vmem:[%s1400_s7 + $0x118] sm:$0xff]  ;;  %v962_v11 = vld [vmem:[%s1400_s7 + $0x188] sm:$0xff]  ;;  %v967_v12 = vld [vmem:[%s1400_s7 + $0x1b0] sm:$0xff] }
  0x18   :  { %120 = vperm.xlu1 %1037, %v76_v28   ;;  %v990_v13 = vld [vmem:[%s1400_s7 + $0x208] sm:$0xff]  ;;  %v989_v14 = vld [vmem:[%s1400_s7 + $0x200] sm:$0xff]  ;;  %v1017_v20 = vld [vmem:[%s1394_s1 + $0x30] sm:$0xff] }
  0x19   :  { %v966_v15 = vld [vmem:[%s1400_s7 + $0x1a8] sm:$0xff]  ;;  %v961_v17 = vld [vmem:[%s1400_s7 + $0x180] sm:$0xff]  ;;  %v992_v21 = vld [vmem:[%s1400_s7 + $0x218] sm:$0xff] }
  0x1a   :  { %v1016_v16 = vld [vmem:[%s1394_s1 + $0x28] sm:$0xff]  ;;  %v1003_v24 = vld [vmem:[%s1400_s7 + $0x280] sm:$0xff] }
  0x1d   :  { %237 = vmatpush.bf16.xpose.msra.mxu0 %v223_v19 }
  0x1e   :  { %105 = vperm.xlu2 %1038, %v73_v48  }
  0x1f   :  { %110 = vperm.xlu0 %1036, %v74_v29  }
  0x20   :  { %95 = vperm.xlu1 %1037, %v71_v34  }
  0x25   :  { %238 = vmatpush.bf16.xpose.msra.mxu0 %v220_v25 }
  0x26   :  { %100 = vperm.xlu2 %1038, %v72_v51  }
  0x27   :  { %85 = vperm.xlu0 %1036, %v69_v35  }
  0x28   :  { %90 = vperm.xlu1 %1037, %v70_v40  }
  0x2d   :  { %239 = vmatpush.bf16.xpose.msra.mxu0 %v217_v31 }
  0x2e   :  { %362 = vperm.xlu2 %1038, %v906_v55  }
  0x2f   :  { %367 = vperm.xlu0 %1036, %v907_v47  }
  0x30   :  { %352 = vperm.xlu1 %1037, %v904_v46  }
  0x35   :  { %240 = vmatpush.bf16.xpose.msra.mxu0 %v214_v37 }
  0x36   :  { %357 = vperm.xlu2 %1038, %v905_v58  }
  0x37   :  { %342 = vperm.xlu0 %1036, %v902_v50  }
  0x38   :  { %347 = vperm.xlu1 %1037, %v903_v49  }
  0x3d   :  { %241 = vmatpush.bf16.xpose.msra.mxu0 %v211_v43 }
  0x3e   :  { %332 = vperm.xlu2 %1038, %v900_v62  }
  0x3f   :  { %337 = vperm.xlu0 %1036, %v901_v54  }
  0x40   :  { %322 = vperm.xlu1 %1037, %v898_v53  }
  0x44   :  { %891 = vmatmul.msk.bf16.vlgmr.msra.gmra.mxu0 %vm188_vm0, %v1011_v45 }
  0x46   :  { %327 = vperm.xlu2 %1038, %v899_v1  }
  0x47   :  { %509 = vperm.xlu0 %1036, %v939_v57  }
  0x48   :  { %514 = vperm.xlu1 %1037, %v940_v56  }
  0x4e   :  { %499 = vperm.xlu2 %1038, %v937_v5  }
  0x4f   :  { %504 = vperm.xlu0 %1036, %v938_v61  }
  0x50   :  { %489 = vperm.xlu1 %1037, %v935_v60  }
  0x54   :  { %892 = vmatmul.msk.bf16.gmra.mxu0 %vm188_vm0, %v1012_v52 }
  0x56   :  { %494 = vperm.xlu2 %1038, %v936_v8  }
  0x57   :  { %479 = vperm.xlu0 %1036, %v933_v0  }
  0x58   :  { %484 = vperm.xlu1 %1037, %v934_v63  }
  0x5e   :  { %640 = vperm.xlu2 %1038, %v967_v12  }
  0x5f   :  { %645 = vperm.xlu0 %1036, %v968_v4  }
  0x60   :  { %630 = vperm.xlu1 %1037, %v965_v3  }
  0x64   :  { %893 = vmatmul.msk.bf16.gmra.mxu0 %vm188_vm0, %v1013_v59 }
  0x66   :  { %635 = vperm.xlu2 %1038, %v966_v15  }
  0x67   :  { %620 = vperm.xlu0 %1036, %v963_v7  }
  0x68   :  { %625 = vperm.xlu1 %1037, %v964_v6   ;;  %v126_v27 = vpop.permute.xlu2 %125 }
  0x6e   :  { %610 = vperm.xlu2 %1038, %v961_v17  }
  0x6f   :  { %615 = vperm.xlu0 %1036, %v962_v11  }
  0x70   :  { %743 = vperm.xlu1 %1037, %v991_v10   ;;  %v131_v31 = vpop.permute.xlu2 %130 }
  0x74   :  { %894 = vmatmul.msk.bf16.gmra.mxu0 %vm188_vm0, %v1014_v2 }
  0x76   :  { %748 = vperm.xlu2 %1038, %v992_v21   ;;  %v1019_v21 = vld [vmem:[%s1395_s2 + $0x8] sm:$0xff] }
  0x77   :  { %733 = vperm.xlu0 %1036, %v989_v14  }
  0x78   :  { %738 = vperm.xlu1 %1037, %v990_v13   ;;  %v106_v40 = vpop.permute.xlu2 %105 }
  0x79   :  { %v146_v18 = vpop.permute.xlu0 %145 }
  0x7a   :  { %v136_v19 = vpop.permute.xlu1 %135 }
  0x7e   :  { %799 = vperm.xlu2 %1038, %v1003_v24   ;;  %v1022_v24 = vld [vmem:[%s1395_s2 + $0x20] sm:$0xff] }
  0x80   :  { %v101_v43 = vpop.permute.xlu2 %100 }
  0x81   :  { %v151_v22 = vpop.permute.xlu0 %150 }
  0x82   :  { %v141_v23 = vpop.permute.xlu1 %140 }
  0x84   :  { %895 = vmatmul.msk.bf16.gmra.mxu0 %vm188_vm0, %v1015_v9 }
  0x89   :  { %v116_v25 = vpop.permute.xlu0 %115 }
  0x8a   :  { %v121_v26 = vpop.permute.xlu1 %120 }
  0x91   :  { %v111_v28 = vpop.permute.xlu0 %110 }
  0x92   :  { %v96_v29 = vpop.permute.xlu1 %95 }
  0x94   :  { %896 = vmatmul.msk.bf16.gmra.mxu0 %vm188_vm0, %v1016_v16 }
  0x99   :  { %v86_v32 = vpop.permute.xlu0 %85 }
  0x9a   :  { %v91_v33 = vpop.permute.xlu1 %90 }
  0xa4   :  { %897 = vmatmul.msk.bf16.gmra.mxu0 %vm188_vm0, %v1017_v20 }
  0xc1   :  { %v243_v30 = vpop.f32.mrf.mxu0 }
  0xc2   :  { %v244_v34 = vadd.f32 %v243_v30, %v86_v32 }
  0xc4   :  { %v278_v37 = vmax.f32 %v244_v34, 0.0 }
  0xc9   :  { %v245_v35 = vpop.f32.mrf.mxu0 }
  0xca   :  { %v246_v36 = vadd.f32 %v245_v35, %v91_v33 }
  0xcc   :  { %v279_v38 = vmax.f32 %v246_v36, 0.0 }
  0xce   :  { %v292_v39 = vpack.c.bf16 %v279_v38, %v278_v37 }
  0xd1   :  { %v248_v41 = vpop.f32.mrf.mxu0 }
  0xd2   :  { %v249_v42 = vadd.f32 %v248_v41, %v96_v29 }
  0xd4   :  { %v280_v46 = vmax.f32 %v249_v42, 0.0 }
  0xd9   :  { %v250_v44 = vpop.f32.mrf.mxu0 }
  0xda   :  { %v251_v45 = vadd.f32 %v250_v44, %v101_v43 }
  0xdc   :  { %v281_v47 = vmax.f32 %v251_v45, 0.0  ;;  %v368_v45 = vpop.permute.xlu0 %367 }
  0xde   :  { %v293_v48 = vpack.c.bf16 %v281_v47, %v280_v46 }
  0xe1   :  { %v253_v49 = vpop.f32.mrf.mxu0 }
  0xe2   :  { %v254_v50 = vadd.f32 %v253_v49, %v106_v40 }
  0xe4   :  { %v282_v53 = vmax.f32 %v254_v50, 0.0  ;;  %v343_v47 = vpop.permute.xlu0 %342 }
  0xe9   :  { %v255_v51 = vpop.f32.mrf.mxu0 }
  0xea   :  { %v256_v52 = vadd.f32 %v255_v51, %v111_v28 }
  0xec   :  { %v283_v54 = vmax.f32 %v256_v52, 0.0 }
  0xee   :  { %v294_v55 = vpack.c.bf16 %v283_v54, %v282_v53 }
  0xf1   :  { %v258_v56 = vpop.f32.mrf.mxu0 }
  0xf2   :  { %v259_v14 = vadd.f32 %v258_v56, %v116_v25  ;;  %v363_v25 = vpop.permute.xlu2 %362 }
  0xf9   :  { %v260_v57 = vpop.f32.mrf.mxu0 }
  0xfa   :  { %v261_v11 = vadd.f32 %v260_v57, %v121_v26  ;;  %v353_v26 = vpop.permute.xlu1 %352 }
  0xfc   :  { %v285_v16 = vmax.f32 %v261_v11, 0.0 }
 0x101   :  { %v263_v58 = vpop.f32.mrf.mxu0 }
 0x102   :  { %v264_v9 = vadd.f32 %v263_v58, %v126_v27  ;;  %v358_v27 = vpop.permute.xlu2 %357  ;;  %v348_v28 = vpop.permute.xlu1 %347 }
 0x104   :  { %v286_v15 = vmax.f32 %v264_v9, 0.0  ;;  %v1026_v9 = vld [vmem:[%s1396_s3 + $0x18] sm:$0xff] }
 0x109   :  { %v265_v59 = vpop.f32.mrf.mxu0 }
 0x10a   :  { %v266_v6 = vadd.f32 %v265_v59, %v131_v31  ;;  %v333_v29 = vpop.permute.xlu2 %332  ;;  %v323_v31 = vpop.permute.xlu1 %322 }
 0x10c   :  { %v287_v12 = vmax.f32 %v266_v6, 0.0  ;;  %v1023_v6 = vld [vmem:[%s1396_s3] sm:$0xff] }
 0x10e   :  { %v296_v17 = vpack.c.bf16 %v287_v12, %v286_v15 }
 0x111   :  { %v268_v60 = vpop.f32.mrf.mxu0 }
 0x112   :  { %v269_v3 = vadd.f32 %v268_v60, %v136_v19  ;;  %v1018_v19 = vld [vmem:[%s1395_s2] sm:$0xff]  ;;  %v328_v33 = vpop.permute.xlu2 %327  ;;  %v338_v60 = vpop.permute.xlu0 %337 }
 0x114   :  { %v288_v10 = vmax.f32 %v269_v3, 0.0 }
 0x119   :  { %v270_v61 = vpop.f32.mrf.mxu0 }
 0x11a   :  { %v271_v1 = vadd.f32 %v270_v61, %v141_v23  ;;  %v1021_v23 = vld [vmem:[%s1395_s2 + $0x18] sm:$0xff] }
 0x11c   :  { %v289_v7 = vmax.f32 %v271_v1, 0.0 }
 0x11e   :  { %v297_v13 = vpack.c.bf16 %v289_v7, %v288_v10  ;;  %v1024_v7 = vld [vmem:[%s1396_s3 + $0x8] sm:$0xff] }
 0x121   :  { %v273_v62 = vpop.f32.mrf.mxu0 }
 0x122   :  { %v274_v63 = vadd.f32 %v273_v62, %v146_v18  ;;  %v284_v18 = vmax.f32 %v259_v14, 0.0 }
 0x124   :  { %v290_v4 = vmax.f32 %v274_v63, 0.0  ;;  %v295_v20 = vpack.c.bf16 %v285_v16, %v284_v18  ;;  %v515_v16 = vpop.permute.xlu1 %514 }
 0x129   :  { %v275_v0 = vpop.f32.mrf.mxu0 }
 0x12a   :  { %v276_v2 = vadd.f32 %v275_v0, %v151_v22  ;;  %v1020_v22 = vld [vmem:[%s1395_s2 + $0x10] sm:$0xff] }
 0x12c   :  { %v291_v5 = vmax.f32 %v276_v2, 0.0 }
 0x12e   :  { %v298_v8 = vpack.c.bf16 %v291_v5, %v290_v4 }
 0x130   :  { %412 = vmatpush.bf16.msra.mxu1 %v298_v8  ;;  %v1025_v8 = vld [vmem:[%s1396_s3 + $0x10] sm:$0xff] }
 0x134   :  { %413 = vmatpush.bf16.msra.mxu1 %v297_v13 }
 0x138   :  { %414 = vmatpush.bf16.msra.mxu1 %v296_v17  ;;  %v510_v17 = vpop.permute.xlu0 %509 }
 0x13c   :  { %415 = vmatpush.bf16.msra.mxu1 %v295_v20  ;;  %v500_v20 = vpop.permute.xlu2 %499 }
 0x140   :  { %416 = vmatpush.bf16.msra.mxu1 %v294_v55 }
 0x144   :  { %417 = vmatpush.bf16.msra.mxu1 %v293_v48 }
 0x148   :  { %418 = vmatpush.bf16.msra.mxu1 %v292_v39 }
 0x14b   :  { %928 = vmatmul.msk.bf16.vlgmr.msra.gmra.mxu1 %vm395_vm1, %v1018_v19  ;;  %v490_v19 = vpop.permute.xlu1 %489 }
 0x15b   :  { %929 = vmatmul.msk.bf16.gmra.mxu1 %vm395_vm1, %v1019_v21 }
 0x16b   :  { %930 = vmatmul.msk.bf16.gmra.mxu1 %vm395_vm1, %v1020_v22  ;;  %v505_v22 = vpop.permute.xlu0 %504 }
 0x17b   :  { %931 = vmatmul.msk.bf16.gmra.mxu1 %vm395_vm1, %v1021_v23 }
 0x18b   :  { %932 = vmatmul.msk.bf16.gmra.mxu1 %vm395_vm1, %v1022_v24 }
 0x1c8   :  { %v420_v30 = vpop.f32.mrf.mxu1 }
 0x1c9   :  { %v421_v32 = vadd.f32 %v420_v30, %v323_v31 }
 0x1cb   :  { %v445_v36 = vmax.f32 %v421_v32, 0.0 }
 0x1d0   :  { %v422_v34 = vpop.f32.mrf.mxu1 }
 0x1d1   :  { %v423_v35 = vadd.f32 %v422_v34, %v328_v33 }
 0x1d3   :  { %v446_v37 = vmax.f32 %v423_v35, 0.0  ;;  %v485_v35 = vpop.permute.xlu1 %484 }
 0x1d5   :  { %v455_v38 = vpack.c.bf16 %v446_v37, %v445_v36 }
 0x1d8   :  { %v425_v39 = vpop.f32.mrf.mxu1 }
 0x1d9   :  { %v426_v0 = vadd.f32 %v425_v39, %v333_v29  ;;  %v495_v29 = vpop.permute.xlu2 %494  ;;  %v480_v39 = vpop.permute.xlu0 %479 }
 0x1db   :  { %v447_v4 = vmax.f32 %v426_v0, 0.0 }
 0x1e0   :  { %v427_v40 = vpop.f32.mrf.mxu1 }
 0x1e1   :  { %v428_v61 = vadd.f32 %v427_v40, %v338_v60 }
 0x1e3   :  { %v448_v2 = vmax.f32 %v428_v61, 0.0 }
 0x1e5   :  { %v456_v5 = vpack.c.bf16 %v448_v2, %v447_v4 }
 0x1e8   :  { %v430_v41 = vpop.f32.mrf.mxu1 }
 0x1e9   :  { %v431_v58 = vadd.f32 %v430_v41, %v343_v47  ;;  %v1028_v47 = vld [vmem:[%s1397_s4 + $0x8] sm:$0xff] }
 0x1eb   :  { %v449_v1 = vmax.f32 %v431_v58, 0.0 }
 0x1f0   :  { %v432_v42 = vpop.f32.mrf.mxu1 }
 0x1f1   :  { %v433_v55 = vadd.f32 %v432_v42, %v348_v28 }
 0x1f3   :  { %v450_v62 = vmax.f32 %v433_v55, 0.0 }
 0x1f5   :  { %v457_v3 = vpack.c.bf16 %v450_v62, %v449_v1 }
 0x1f8   :  { %v435_v43 = vpop.f32.mrf.mxu1 }
 0x1f9   :  { %v436_v52 = vadd.f32 %v435_v43, %v353_v26 }
 0x1fb   :  { %v451_v59 = vmax.f32 %v436_v52, 0.0 }
 0x200   :  { %v437_v44 = vpop.f32.mrf.mxu1 }
 0x201   :  { %v438_v50 = vadd.f32 %v437_v44, %v358_v27 }
 0x203   :  { %v452_v56 = vmax.f32 %v438_v50, 0.0 }
 0x205   :  { %v458_v63 = vpack.c.bf16 %v452_v56, %v451_v59  ;;  %v646_v56 = vpop.permute.xlu0 %645  ;;  %v631_v59 = vpop.permute.xlu1 %630 }
 0x208   :  { %v440_v46 = vpop.f32.mrf.mxu1 }
 0x209   :  { %v441_v48 = vadd.f32 %v440_v46, %v363_v25  ;;  %v1027_v46 = vld [vmem:[%s1397_s4] sm:$0xff] }
 0x20b   :  { %v453_v53 = vmax.f32 %v441_v48, 0.0  ;;  %v1029_v48 = vld [vmem:[%s1397_s4 + $0x10] sm:$0xff] }
 0x20d   :  { %v621_v60 = vpop.permute.xlu0 %620 }
 0x210   :  { %v442_v49 = vpop.f32.mrf.mxu1 }
 0x211   :  { %v443_v51 = vadd.f32 %v442_v49, %v368_v45  ;;  %v1030_v49 = vld [vmem:[%s1397_s4 + $0x18] sm:$0xff] }
 0x213   :  { %v454_v54 = vmax.f32 %v443_v51, 0.0 }
 0x215   :  { %v459_v57 = vpack.c.bf16 %v454_v54, %v453_v53 }
 0x217   :  { %553 = vmatpush.bf16.msra.mxu2 %v459_v57  ;;  %v641_v57 = vpop.permute.xlu2 %640 }
 0x21b   :  { %554 = vmatpush.bf16.msra.mxu2 %v458_v63 }
 0x21f   :  { %555 = vmatpush.bf16.msra.mxu2 %v457_v3  ;;  %v636_v62 = vpop.permute.xlu2 %635 }
 0x223   :  { %556 = vmatpush.bf16.msra.mxu2 %v456_v5  ;;  %v626_v5 = vpop.permute.xlu1 %625 }
 0x227   :  { %557 = vmatpush.bf16.msra.mxu2 %v455_v38 }
 0x22a   :  { %957 = vmatmul.msk.bf16.vlgmr.msra.gmra.mxu2 %vm537_vm2, %v1023_v6 }
 0x23a   :  { %958 = vmatmul.msk.bf16.gmra.mxu2 %vm537_vm2, %v1024_v7 }
 0x24a   :  { %959 = vmatmul.msk.bf16.gmra.mxu2 %vm537_vm2, %v1025_v8 }
 0x25a   :  { %960 = vmatmul.msk.bf16.gmra.mxu2 %vm537_vm2, %v1026_v9 }
 0x2ad   :  { %v559_v10 = vpop.f32.mrf.mxu2 }
 0x2ae   :  { %v560_v40 = vadd.f32 %v559_v10, %v480_v39 }
 0x2b0   :  { %v579_v44 = vmax.f32 %v560_v40, 0.0 }
 0x2b5   :  { %v561_v11 = vpop.f32.mrf.mxu2 }
 0x2b6   :  { %v562_v36 = vadd.f32 %v561_v11, %v485_v35  ;;  %v616_v11 = vpop.permute.xlu0 %615 }
 0x2b8   :  { %v580_v42 = vmax.f32 %v562_v36, 0.0 }
 0x2ba   :  { %v587_v45 = vpack.c.bf16 %v580_v42, %v579_v44  ;;  %v1033_v42 = vld [vmem:[%s1399_s6] sm:$0xff]  ;;  %s1070_s6 = smov [#allocation2]  }
 0x2bb   :  { %s852_s28 = sshll.u32 %s1070_s6, 4  ;;  %s853_s28 = int_to_ptr.vmem [resolvable:$true] %s852_s28 }
 0x2bd   :  { %v564_v12 = vpop.f32.mrf.mxu2 }
 0x2be   :  { %v565_v33 = vadd.f32 %v564_v12, %v490_v19 }
 0x2c0   :  { %v581_v41 = vmax.f32 %v565_v33, 0.0 }
 0x2c5   :  { %v566_v13 = vpop.f32.mrf.mxu2 }
 0x2c6   :  { %v567_v30 = vadd.f32 %v566_v13, %v495_v29 }
 0x2c8   :  { %v582_v37 = vmax.f32 %v567_v30, 0.0 }
 0x2ca   :  { %v588_v43 = vpack.c.bf16 %v582_v37, %v581_v41 }
 0x2cd   :  { %v569_v14 = vpop.f32.mrf.mxu2 }
 0x2ce   :  { %v570_v26 = vadd.f32 %v569_v14, %v500_v20 }
 0x2d0   :  { %v583_v34 = vmax.f32 %v570_v26, 0.0  ;;  %v744_v26 = vpop.permute.xlu1 %743 }
 0x2d5   :  { %v571_v15 = vpop.f32.mrf.mxu2 }
 0x2d6   :  { %v572_v24 = vadd.f32 %v571_v15, %v505_v22  ;;  %v611_v15 = vpop.permute.xlu2 %610  ;;  %v1031_v22 = vld [vmem:[%s1398_s5] sm:$0xff] }
 0x2d8   :  { %v584_v31 = vmax.f32 %v572_v24, 0.0  ;;  %v739_v30 = vpop.permute.xlu1 %738 }
 0x2da   :  { %v589_v38 = vpack.c.bf16 %v584_v31, %v583_v34  ;;  %v734_v34 = vpop.permute.xlu0 %733 }
 0x2dd   :  { %v574_v18 = vpop.f32.mrf.mxu2 }
 0x2de   :  { %v575_v21 = vadd.f32 %v574_v18, %v510_v17 }
 0x2e0   :  { %v585_v27 = vmax.f32 %v575_v21, 0.0 }
 0x2e5   :  { %v576_v23 = vpop.f32.mrf.mxu2 }
 0x2e6   :  { %v577_v25 = vadd.f32 %v576_v23, %v515_v16  ;;  %v1032_v23 = vld [vmem:[%s1398_s5 + $0x8] sm:$0xff] }
 0x2e8   :  { %v586_v28 = vmax.f32 %v577_v25, 0.0 }
 0x2ea   :  { %v590_v32 = vpack.c.bf16 %v586_v28, %v585_v27  ;;  %v749_v28 = vpop.permute.xlu2 %748 }
 0x2ec   :  { %685 = vmatpush.bf16.msra.mxu3 %v590_v32 }
 0x2f0   :  { %686 = vmatpush.bf16.msra.mxu3 %v589_v38 }
 0x2f4   :  { %687 = vmatpush.bf16.msra.mxu3 %v588_v43  ;;  %v800_v43 = vpop.permute.xlu2 %799 }
 0x2f8   :  { %688 = vmatpush.bf16.msra.mxu3 %v587_v45 }
 0x2fb   :  { %985 = vmatmul.msk.bf16.vlgmr.msra.gmra.mxu3 %vm668_vm3, %v1027_v46 }
 0x30b   :  { %986 = vmatmul.msk.bf16.gmra.mxu3 %vm668_vm3, %v1028_v47 }
 0x31b   :  { %987 = vmatmul.msk.bf16.gmra.mxu3 %vm668_vm3, %v1029_v48 }
 0x32b   :  { %988 = vmatmul.msk.bf16.gmra.mxu3 %vm668_vm3, %v1030_v49 }
 0x37e   :  { %v690_v50 = vpop.f32.mrf.mxu3 }
 0x37f   :  { %v691_v16 = vadd.f32 %v690_v50, %v611_v15 }
 0x381   :  { %v710_v19 = vmax.f32 %v691_v16, 0.0 }
 0x386   :  { %v692_v51 = vpop.f32.mrf.mxu3 }
 0x387   :  { %v693_v12 = vadd.f32 %v692_v51, %v616_v11 }
 0x389   :  { %v711_v18 = vmax.f32 %v693_v12, 0.0 }
 0x38b   :  { %v718_v21 = vpack.c.bf16 %v711_v18, %v710_v19 }
 0x38e   :  { %v695_v52 = vpop.f32.mrf.mxu3 }
 0x38f   :  { %v696_v9 = vadd.f32 %v695_v52, %v621_v60 }
 0x391   :  { %v712_v17 = vmax.f32 %v696_v9, 0.0 }
 0x396   :  { %v697_v53 = vpop.f32.mrf.mxu3 }
 0x397   :  { %v698_v6 = vadd.f32 %v697_v53, %v626_v5 }
 0x399   :  { %v713_v13 = vmax.f32 %v698_v6, 0.0 }
 0x39b   :  { %v719_v20 = vpack.c.bf16 %v713_v13, %v712_v17 }
 0x39e   :  { %v700_v54 = vpop.f32.mrf.mxu3 }
 0x39f   :  { %v701_v2 = vadd.f32 %v700_v54, %v631_v59 }
 0x3a1   :  { %v714_v10 = vmax.f32 %v701_v2, 0.0 }
 0x3a6   :  { %v702_v55 = vpop.f32.mrf.mxu3 }
 0x3a7   :  { %v703_v0 = vadd.f32 %v702_v55, %v636_v62 }
 0x3a9   :  { %v715_v7 = vmax.f32 %v703_v0, 0.0 }
 0x3ab   :  { %v720_v14 = vpack.c.bf16 %v715_v7, %v714_v10 }
 0x3ae   :  { %v705_v58 = vpop.f32.mrf.mxu3 }
 0x3af   :  { %v706_v61 = vadd.f32 %v705_v58, %v641_v57 }
 0x3b1   :  { %v716_v3 = vmax.f32 %v706_v61, 0.0 }
 0x3b6   :  { %v707_v63 = vpop.f32.mrf.mxu3 }
 0x3b7   :  { %v708_v1 = vadd.f32 %v707_v63, %v646_v56 }
 0x3b9   :  { %v717_v4 = vmax.f32 %v708_v1, 0.0 }
 0x3bb   :  { %v721_v8 = vpack.c.bf16 %v717_v4, %v716_v3 }
 0x3bd   :  { %771 = vmatpush.bf16.msrb.mxu3 %v721_v8 }
 0x3c1   :  { %772 = vmatpush.bf16.msrb.mxu3 %v720_v14 }
 0x3c5   :  { %773 = vmatpush.bf16.msrb.mxu3 %v719_v20 }
 0x3c9   :  { %774 = vmatpush.bf16.msrb.mxu3 %v718_v21 }
 0x3cc   :  { %1001 = vmatmul.msk.bf16.vlgmr.msrb.gmra.mxu3 %vm668_vm3, %v1031_v22 }
 0x3dc   :  { %1002 = vmatmul.msk.bf16.gmra.mxu3 %vm668_vm3, %v1032_v23 }
 0x44f   :  { %v776_v24 = vpop.f32.mrf.mxu3 }
 0x450   :  { %v777_v35 = vadd.f32 %v776_v24, %v734_v34 }
 0x452   :  { %v786_v40 = vmax.f32 %v777_v35, 0.0 }
 0x457   :  { %v778_v25 = vpop.f32.mrf.mxu3 }
 0x458   :  { %v779_v32 = vadd.f32 %v778_v25, %v739_v30 }
 0x45a   :  { %v787_v38 = vmax.f32 %v779_v32, 0.0 }
 0x45c   :  { %v790_v41 = vpack.c.bf16 %v787_v38, %v786_v40 }
 0x45f   :  { %v781_v27 = vpop.f32.mrf.mxu3 }
 0x460   :  { %v782_v29 = vadd.f32 %v781_v27, %v744_v26 }
 0x462   :  { %v788_v36 = vmax.f32 %v782_v29, 0.0 }
 0x467   :  { %v783_v31 = vpop.f32.mrf.mxu3 }
 0x468   :  { %v784_v33 = vadd.f32 %v783_v31, %v749_v28 }
 0x46a   :  { %v789_v37 = vmax.f32 %v784_v33, 0.0 }
 0x46c   :  { %v791_v39 = vpack.c.bf16 %v789_v37, %v788_v36 }
 0x46e   :  { %820 = vmatpush.bf16.msrb.mxu2 %v791_v39 }
 0x472   :  { %821 = vmatpush.bf16.msrb.mxu2 %v790_v41 }
 0x475   :  { %1009 = vmatmul.msk.bf16.vlgmr.msrb.gmra.mxu2 %vm188_vm0, %v1033_v42 }
 0x4f8   :  { %v823_v44 = vpop.f32.mrf.mxu2 }
 0x4f9   :  { %v824_v45 = vadd.f32 %v823_v44, %v800_v43 }
 0x4fb   :  { %v1010_v46 = vmul.f32 -1.442695, %v824_v45 }
 0x4fd   :  { %1039 = vpow2.f32 %v1010_v46 }
 0x500   :  { %v825_v47 = vpop.f32.mrf.mxu2 }
 0x503   :  { %v1040_v48 = vpop.eup %1039 }
 0x504   :  { %v830_v49 = vadd.f32 1.0, %v1040_v48 }
 0x506   :  { %1041 = vrcp.f32 %v830_v49  ;;  %v842_v53 = vand.u32 2147483648, %v830_v49  ;;  %v840_v55 = vand.u32 2147483647, %v830_v49  ;;  %vm836_vm5 = vweird.f32 %v830_v49 }
 0x508   :  { %v843_v57 = vor.u32 1.1754944e-38, %v842_v53  ;;  %vm841_vm7 = vcmp.eq.f32.partialorder %v840_v55, 8.507059e+37 }
 0x50c   :  { %v1042_v50 = vpop.eup %1041 }
 0x50d   :  { %v832_v51 = vmul.f32 %v1042_v50, %v830_v49  ;;  %vm837_vm4 = vweird.f32 %v1042_v50 }
 0x50e   :  { %vm838_vm6 = vmor %vm836_vm5, %vm837_vm4 }
 0x50f   :  { %v833_v52 = vsub.f32 1.0, %v832_v51 }
 0x511   :  { %v834_v54 = vmul.f32 %v1042_v50, %v833_v52 }
 0x513   :  { %v835_v56 = vadd.f32 %v1042_v50, %v834_v54 }
 0x515   :  { %v839_v58 = vsel %vm838_vm6, %v1042_v50, %v835_v56 }
 0x516   :  { %v844_v59 = vsel %vm841_vm7, %v843_v57, %v839_v58 }
 0x517   :  { %846 = vst [vmem:[#allocation2] sm:$0x1] %v844_v59 }
 0x518   :  { %857 = dma.vmem_to_hbm [thread:$0]  %s853_s28, 16, %s855_s9, [#allocation3]  }
 0x519   :  { %1067 = dma.done.wait [#allocation3], 16  }
 0x51a   :  { %1068 = vsyncadd [#allocation3], 4294967280 }
 0x51b   :  { %862 = vsyncpa [#allocation3], 1 }

</bundles_post_ra>
